<compile_context>
chip_gen: v7x
topology: tpu7x:2x2x1
jax: 0.10.0
libtpu: 0.0.40
codegen_flags: <defaults>
</compile_context>

<pallas_src>
import jax
import jax.numpy as jnp
from jax.experimental import pallas as pl
from jax.experimental.pallas import tpu as pltpu


# ------------------------------- Pallas kernels -----------------------------

def _conv_relu_pool_kernel(p_ref, w_ref, b_ref, o_ref):
    # p_ref: (TB, 4, KK, SP) bf16  corner-partitioned im2col patches
    #        (corner d of pooled window p == conv output position (2ph+dh, 2pw+dw))
    # w_ref: (OC, KK)        bf16  conv weights, PyTorch (c, kh, kw) column order
    # b_ref: (OC, 1)         f32   bias
    # o_ref: (TB, OC, SP)    bf16  pooled output (already in pooled NCHW order)
    w = w_ref[...]
    b = b_ref[...]
    tb = p_ref.shape[0]
    for t in range(tb):                      # static, fully unrolled (TB <= 16)
        # maxpool2x2(relu(conv+b)) == relu(max_d(conv_d) + b)  (monotonicity)
        y = jnp.dot(w, p_ref[t, 0], preferred_element_type=jnp.float32)
        for d in range(1, 4):
            y = jnp.maximum(
                y, jnp.dot(w, p_ref[t, d], preferred_element_type=jnp.float32))
        o_ref[t] = jnp.maximum(y + b, 0.0).astype(o_ref.dtype)


def _fc_fused_kernel(x_ref, w1_ref, b1_ref, w2_ref, b2_ref, w3_ref, b3_ref, o_ref):
    # All three Linear layers back-to-back; intermediates stay in VMEM/vregs.
    h = jnp.dot(x_ref[...], w1_ref[...], preferred_element_type=jnp.float32)
    h = jnp.maximum(h + b1_ref[...], 0.0)
    h = jnp.dot(h.astype(w2_ref.dtype), w2_ref[...],
                preferred_element_type=jnp.float32)
    h = jnp.maximum(h + b2_ref[...], 0.0)
    h = jnp.dot(h.astype(w3_ref.dtype), w3_ref[...],
                preferred_element_type=jnp.float32)
    o_ref[...] = jnp.maximum(h + b3_ref[...], 0.0)   # module applies F.relu to fc3


# -------------------------------- glue helpers ------------------------------

def _im2col_corners(x, K):
    """x: (B, C, H, W) -> (B, 4, C*K*K, (OH//2)*(OW//2)).
    Patch rows ordered (c, kh, kw) to match PyTorch weight.reshape(OC, C*K*K);
    corner d = (dh, dw) holds the patches of conv-output positions
    (2ph+dh, 2pw+dw), so max over d == 2x2/stride-2 max-pool."""
    B, C, H, W = x.shape
    OH, OW = H - K + 1, W - K + 1
    assert OH % 2 == 0 and OW % 2 == 0, "MaxPool2d(2,2) needs even conv output"
    OHh, OWh = OH // 2, OW // 2
    cols = [x[:, :, kh:kh + OH, kw:kw + OW] for kh in range(K) for kw in range(K)]
    p = jnp.stack(cols, axis=2).reshape(B, C * K * K, OH, OW)
    corners = [p[:, :, dh::2, dw::2].reshape(B, C * K * K, OHh * OWh)
               for dh in (0, 1) for dw in (0, 1)]
    return jnp.stack(corners, axis=1), OHh, OWh


def _pick_batch_tile(B, cap):
    """Largest divisor of B that is <= cap, adjusted so the batch grid keeps
    >= 2 steps when possible (so v7x's second TensorCore has work)."""
    tb = 1
    for d in range(1, min(B, cap) + 1):
        if B % d == 0:
            tb = d
    while B // tb < 2 and tb > 1:
        tb -= 1
        while tb > 1 and B % tb != 0:
            tb -= 1
    return max(tb, 1)


def _compiler_params(sem):
    return pltpu.CompilerParams(dimension_semantics=sem,
                                vmem_limit_bytes=32 * 1024 * 1024)


# ------------------------------ fused layer calls ----------------------------

def conv_relu_pool(x, w, b, *, tb_cap=16):
    """maxpool2x2(relu(conv2d(x, w, b))), valid padding, stride 1.
    x: (B, C, H, W) (any float dtype), w: (OC, C, K, K), b: (OC,).
    Returns NCHW bf16: (B, OC, OH//2, OW//2)."""
    B, C, H, W = x.shape
    OC, _, K, _ = w.shape
    patches, OHh, OWh = _im2col_corners(x.astype(jnp.bfloat16), K)  # bf16 patches
    KK, SP = C * K * K, OHh * OWh
    TB = _pick_batch_tile(B, tb_cap)

    wm = w.reshape(OC, KK).astype(jnp.bfloat16)
    b2 = b.reshape(OC, 1).astype(jnp.float32)

    out = pl.pallas_call(
        _conv_relu_pool_kernel,
        out_shape=jax.ShapeDtypeStruct((B, OC, SP), jnp.bfloat16),
        grid=(B // TB,),
        in_specs=[
            pl.BlockSpec((TB, 4, KK, SP), lambda g: (g, 0, 0, 0)),  # this tile's patches
            pl.BlockSpec((OC, KK), lambda g: (0, 0)),               # weights (resident)
            pl.BlockSpec((OC, 1), lambda g: (0, 0)),                # bias (resident)
        ],
        out_specs=pl.BlockSpec((TB, OC, SP), lambda g: (g, 0, 0)),
        compiler_params=_compiler_params(("parallel",)),
    )(patches, wm, b2)
    return out.reshape(B, OC, OHh, OWh)       # free row-major reshape -> NCHW


def fc3_fused(x, w1, b1, w2, b2, w3, b3):
    """relu(fc3(relu(fc2(relu(fc1(x)))))) in a single Pallas kernel.
    Single grid step: all three FC weights are ~118 KB bf16 and the bf16 x tile
    is 0.8 KB/sample, so everything stays VMEM-resident."""
    B, D = x.shape
    H1, H2, NC = w1.shape[0], w2.shape[0], w3.shape[0]
    return pl.pallas_call(
        _fc_fused_kernel,
        out_shape=jax.ShapeDtypeStruct((B, NC), jnp.float32),
        grid=(1,),
        in_specs=[
            pl.BlockSpec((B, D), lambda i: (0, 0)),
            pl.BlockSpec((D, H1), lambda i: (0, 0)),
            pl.BlockSpec((1, H1), lambda i: (0, 0)),
            pl.BlockSpec((H1, H2), lambda i: (0, 0)),
            pl.BlockSpec((1, H2), lambda i: (0, 0)),
            pl.BlockSpec((H2, NC), lambda i: (0, 0)),
            pl.BlockSpec((1, NC), lambda i: (0, 0)),
        ],
        out_specs=pl.BlockSpec((B, NC), lambda i: (0, 0)),
        compiler_params=_compiler_params(("arbitrary",)),
    )(
        x.astype(jnp.bfloat16),
        w1.T.astype(jnp.bfloat16), b1.reshape(1, H1).astype(jnp.float32),
        w2.T.astype(jnp.bfloat16), b2.reshape(1, H2).astype(jnp.float32),
        w3.T.astype(jnp.bfloat16), b3.reshape(1, NC).astype(jnp.float32),
    )


# -------------------------------- model forward ------------------------------

def init_params(key):
    keys = jax.random.split(key, 10)

    def u(k, shape, fan_in):
        bound = 1.0 / jnp.sqrt(jnp.float32(fan_in))
        return jax.random.uniform(k, shape, jnp.float32, -bound, bound)

    return {
        "conv1_w": u(keys[0], (6, 3, 5, 5), 3 * 5 * 5),
        "conv1_b": u(keys[1], (6,), 3 * 5 * 5),
        "conv2_w": u(keys[2], (16, 6, 5, 5), 6 * 5 * 5),
        "conv2_b": u(keys[3], (16,), 6 * 5 * 5),
        "fc1_w": u(keys[4], (120, 16 * 5 * 5), 16 * 5 * 5),
        "fc1_b": u(keys[5], (120,), 16 * 5 * 5),
        "fc2_w": u(keys[6], (84, 120), 120),
        "fc2_b": u(keys[7], (84,), 120),
        "fc3_w": u(keys[8], (10, 84), 84),
        "fc3_b": u(keys[9], (10,), 84),
    }


def pytorch_cnn_forward(params, x):
    # x: (B, 3, 32, 32) NCHW
    x = x.astype(jnp.bfloat16)                                    # bf16 activations throughout
    x = conv_relu_pool(x, params["conv1_w"], params["conv1_b"])   # (B, 6, 14, 14) bf16
    x = conv_relu_pool(x, params["conv2_w"], params["conv2_b"])   # (B, 16, 5, 5)  bf16
    x = x.reshape(x.shape[0], -1)                                 # torch.flatten(x, 1) -> (B, 400), (c,h,w) order
    return fc3_fused(x, params["fc1_w"], params["fc1_b"],
                     params["fc2_w"], params["fc2_b"],
                     params["fc3_w"], params["fc3_b"])            # (B, 10), ReLU'd as in the module


if __name__ == "__main__":
    key = jax.random.PRNGKey(0)
    pkey, xkey = jax.random.split(key)
    params = init_params(pkey)
    # fc1 (16*5*5 inputs) implies a 32x32 spatial input with 3 channels.
    x = jax.random.normal(xkey, (2, 3, 32, 32), dtype=jnp.float32)
    fwd = jax.jit(pytorch_cnn_forward)
    out = fwd(params, x)
    jax.block_until_ready(out)
    assert out.shape == (2, 10), out.shape
    assert bool(jnp.all(out >= 0.0))   # final ReLU applied, matching the PyTorch forward
    print("KERNEL_OK")
</pallas_src>

<mosaic_0001>
module attributes {stable_mosaic.version = 11 : i64} {
  func.func @_conv_relu_pool_kernel(%arg0: i32, %arg1: memref<1x4x75x196xbf16, #tpu.memory_space<vmem>>, %arg2: memref<6x75xbf16, #tpu.memory_space<vmem>>, %arg3: memref<6x1xf32, #tpu.memory_space<vmem>>, %arg4: memref<1x6x196xbf16, #tpu.memory_space<vmem>>) attributes {dimension_semantics = [#tpu.dimension_semantics<parallel>], iteration_bounds = array<i64: 2>, scalar_prefetch = 0 : i64, scratch_operands = 0 : i64, tpu.core_type = #tpu.core_type<tc>, window_params = [{transform_indices = @transform_0, window_bounds = array<i64: 1, 4, 75, 196>}, {pipeline_mode = #tpu.pipeline_mode<synchronous>, transform_indices = @transform_1, window_bounds = array<i64: 6, 75>}, {pipeline_mode = #tpu.pipeline_mode<synchronous>, transform_indices = @transform_2, window_bounds = array<i64: 6, 1>}, {transform_indices = @transform_3, window_bounds = array<i64: 1, 6, 196>}]} {
    %c0 = arith.constant 0 : index
    %c0_0 = arith.constant 0 : index
    %0 = vector.load %arg2[%c0, %c0_0] : memref<6x75xbf16, #tpu.memory_space<vmem>>, vector<6x75xbf16>
    %c0_1 = arith.constant 0 : index
    %c0_2 = arith.constant 0 : index
    %1 = vector.load %arg3[%c0_1, %c0_2] : memref<6x1xf32, #tpu.memory_space<vmem>>, vector<6x1xf32>
    %c0_3 = arith.constant 0 : index
    %c0_4 = arith.constant 0 : index
    %c0_5 = arith.constant 0 : index
    %c0_6 = arith.constant 0 : index
    %2 = vector.load %arg1[%c0_3, %c0_4, %c0_5, %c0_6] : memref<1x4x75x196xbf16, #tpu.memory_space<vmem>>, vector<1x1x75x196xbf16>
    %3 = vector.shape_cast %2 : vector<1x1x75x196xbf16> to vector<75x196xbf16>
    %cst = arith.constant dense<0.000000e+00> : vector<6x196xf32>
    %4 = tpu.matmul %0, %3, %cst {dimension_numbers = #tpu.dot_dimension_numbers<[1], [0], [0], [1], [0, 0, 1, 1], [], []>} : vector<6x75xbf16>, vector<75x196xbf16>, vector<6x196xf32> -> vector<6x196xf32>
    %c0_7 = arith.constant 0 : index
    %c1 = arith.constant 1 : index
    %c0_8 = arith.constant 0 : index
    %c0_9 = arith.constant 0 : index
    %5 = vector.load %arg1[%c0_7, %c1, %c0_8, %c0_9] : memref<1x4x75x196xbf16, #tpu.memory_space<vmem>>, vector<1x1x75x196xbf16>
    %6 = vector.shape_cast %5 : vector<1x1x75x196xbf16> to vector<75x196xbf16>
    %cst_10 = arith.constant dense<0.000000e+00> : vector<6x196xf32>
    %7 = tpu.matmul %0, %6, %cst_10 {dimension_numbers = #tpu.dot_dimension_numbers<[1], [0], [0], [1], [0, 0, 1, 1], [], []>} : vector<6x75xbf16>, vector<75x196xbf16>, vector<6x196xf32> -> vector<6x196xf32>
    %8 = arith.maximumf %4, %7 : vector<6x196xf32>
    %c0_11 = arith.constant 0 : index
    %c2 = arith.constant 2 : index
    %c0_12 = arith.constant 0 : index
    %c0_13 = arith.constant 0 : index
    %9 = vector.load %arg1[%c0_11, %c2, %c0_12, %c0_13] : memref<1x4x75x196xbf16, #tpu.memory_space<vmem>>, vector<1x1x75x196xbf16>
    %10 = vector.shape_cast %9 : vector<1x1x75x196xbf16> to vector<75x196xbf16>
    %cst_14 = arith.constant dense<0.000000e+00> : vector<6x196xf32>
    %11 = tpu.matmul %0, %10, %cst_14 {dimension_numbers = #tpu.dot_dimension_numbers<[1], [0], [0], [1], [0, 0, 1, 1], [], []>} : vector<6x75xbf16>, vector<75x196xbf16>, vector<6x196xf32> -> vector<6x196xf32>
    %12 = arith.maximumf %8, %11 : vector<6x196xf32>
    %c0_15 = arith.constant 0 : index
    %c3 = arith.constant 3 : index
    %c0_16 = arith.constant 0 : index
    %c0_17 = arith.constant 0 : index
    %13 = vector.load %arg1[%c0_15, %c3, %c0_16, %c0_17] : memref<1x4x75x196xbf16, #tpu.memory_space<vmem>>, vector<1x1x75x196xbf16>
    %14 = vector.shape_cast %13 : vector<1x1x75x196xbf16> to vector<75x196xbf16>
    %cst_18 = arith.constant dense<0.000000e+00> : vector<6x196xf32>
    %15 = tpu.matmul %0, %14, %cst_18 {dimension_numbers = #tpu.dot_dimension_numbers<[1], [0], [0], [1], [0, 0, 1, 1], [], []>} : vector<6x75xbf16>, vector<75x196xbf16>, vector<6x196xf32> -> vector<6x196xf32>
    %16 = arith.maximumf %12, %15 : vector<6x196xf32>
    %17 = vector.broadcast %1 : vector<6x1xf32> to vector<6x196xf32>
    %18 = arith.addf %16, %17 : vector<6x196xf32>
    %cst_19 = arith.constant 0.000000e+00 : f32
    %19 = vector.broadcast %cst_19 : f32 to vector<6x196xf32>
    %20 = arith.maximumf %18, %19 : vector<6x196xf32>
    %21 = arith.truncf %20 : vector<6x196xf32> to vector<6x196xbf16>
    %c0_20 = arith.constant 0 : index
    %c0_21 = arith.constant 0 : index
    %c0_22 = arith.constant 0 : index
    %22 = vector.load %arg4[%c0_20, %c0_21, %c0_22] : memref<1x6x196xbf16, #tpu.memory_space<vmem>>, vector<1x6x196xbf16>
    %23 = vector.shape_cast %22 : vector<1x6x196xbf16> to vector<6x196xbf16>
    %24 = vector.shape_cast %21 : vector<6x196xbf16> to vector<1x6x196xbf16>
    tpu.vector_store %arg4[%c0_20, %c0_21, %c0_22], %24 {strides = array<i32>} : memref<1x6x196xbf16, #tpu.memory_space<vmem>>, vector<1x6x196xbf16>,
    return
  }
  func.func @transform_0(%arg0: i32) -> (i32, i32, i32, i32) {
    %c0_i32 = arith.constant 0 : i32
    %c0_i32_0 = arith.constant 0 : i32
    %c0_i32_1 = arith.constant 0 : i32
    %c0_i32_2 = arith.constant 0 : i32
    return %arg0, %c0_i32, %c0_i32_0, %c0_i32_1 : i32, i32, i32, i32
  }
  func.func @transform_1(%arg0: i32) -> (i32, i32) {
    %c0_i32 = arith.constant 0 : i32
    %c0_i32_0 = arith.constant 0 : i32
    %c0_i32_1 = arith.constant 0 : i32
    return %c0_i32, %c0_i32_0 : i32, i32
  }
  func.func @transform_2(%arg0: i32) -> (i32, i32) {
    %c0_i32 = arith.constant 0 : i32
    %c0_i32_0 = arith.constant 0 : i32
    %c0_i32_1 = arith.constant 0 : i32
    return %c0_i32, %c0_i32_0 : i32, i32
  }
  func.func @transform_3(%arg0: i32) -> (i32, i32, i32) {
    %c0_i32 = arith.constant 0 : i32
    %c0_i32_0 = arith.constant 0 : i32
    %c0_i32_1 = arith.constant 0 : i32
    return %arg0, %c0_i32, %c0_i32_0 : i32, i32, i32
  }
}

module attributes {stable_mosaic.version = 11 : i64} {
  func.func @_conv_relu_pool_kernel(%arg0: i32, %arg1: memref<1x4x150x25xbf16, #tpu.memory_space<vmem>>, %arg2: memref<16x150xbf16, #tpu.memory_space<vmem>>, %arg3: memref<16x1xf32, #tpu.memory_space<vmem>>, %arg4: memref<1x16x25xbf16, #tpu.memory_space<vmem>>) attributes {dimension_semantics = [#tpu.dimension_semantics<parallel>], iteration_bounds = array<i64: 2>, scalar_prefetch = 0 : i64, scratch_operands = 0 : i64, tpu.core_type = #tpu.core_type<tc>, window_params = [{transform_indices = @transform_0, window_bounds = array<i64: 1, 4, 150, 25>}, {pipeline_mode = #tpu.pipeline_mode<synchronous>, transform_indices = @transform_1, window_bounds = array<i64: 16, 150>}, {pipeline_mode = #tpu.pipeline_mode<synchronous>, transform_indices = @transform_2, window_bounds = array<i64: 16, 1>}, {transform_indices = @transform_3, window_bounds = array<i64: 1, 16, 25>}]} {
    %c0 = arith.constant 0 : index
    %c0_0 = arith.constant 0 : index
    %0 = vector.load %arg2[%c0, %c0_0] : memref<16x150xbf16, #tpu.memory_space<vmem>>, vector<16x150xbf16>
    %c0_1 = arith.constant 0 : index
    %c0_2 = arith.constant 0 : index
    %1 = vector.load %arg3[%c0_1, %c0_2] : memref<16x1xf32, #tpu.memory_space<vmem>>, vector<16x1xf32>
    %c0_3 = arith.constant 0 : index
    %c0_4 = arith.constant 0 : index
    %c0_5 = arith.constant 0 : index
    %c0_6 = arith.constant 0 : index
    %2 = vector.load %arg1[%c0_3, %c0_4, %c0_5, %c0_6] : memref<1x4x150x25xbf16, #tpu.memory_space<vmem>>, vector<1x1x150x25xbf16>
    %3 = vector.shape_cast %2 : vector<1x1x150x25xbf16> to vector<150x25xbf16>
    %cst = arith.constant dense<0.000000e+00> : vector<16x25xf32>
    %4 = tpu.matmul %0, %3, %cst {dimension_numbers = #tpu.dot_dimension_numbers<[1], [0], [0], [1], [0, 0, 1, 1], [], []>} : vector<16x150xbf16>, vector<150x25xbf16>, vector<16x25xf32> -> vector<16x25xf32>
    %c0_7 = arith.constant 0 : index
    %c1 = arith.constant 1 : index
    %c0_8 = arith.constant 0 : index
    %c0_9 = arith.constant 0 : index
    %5 = vector.load %arg1[%c0_7, %c1, %c0_8, %c0_9] : memref<1x4x150x25xbf16, #tpu.memory_space<vmem>>, vector<1x1x150x25xbf16>
    %6 = vector.shape_cast %5 : vector<1x1x150x25xbf16> to vector<150x25xbf16>
    %cst_10 = arith.constant dense<0.000000e+00> : vector<16x25xf32>
    %7 = tpu.matmul %0, %6, %cst_10 {dimension_numbers = #tpu.dot_dimension_numbers<[1], [0], [0], [1], [0, 0, 1, 1], [], []>} : vector<16x150xbf16>, vector<150x25xbf16>, vector<16x25xf32> -> vector<16x25xf32>
    %8 = arith.maximumf %4, %7 : vector<16x25xf32>
    %c0_11 = arith.constant 0 : index
    %c2 = arith.constant 2 : index
    %c0_12 = arith.constant 0 : index
    %c0_13 = arith.constant 0 : index
    %9 = vector.load %arg1[%c0_11, %c2, %c0_12, %c0_13] : memref<1x4x150x25xbf16, #tpu.memory_space<vmem>>, vector<1x1x150x25xbf16>
    %10 = vector.shape_cast %9 : vector<1x1x150x25xbf16> to vector<150x25xbf16>
    %cst_14 = arith.constant dense<0.000000e+00> : vector<16x25xf32>
    %11 = tpu.matmul %0, %10, %cst_14 {dimension_numbers = #tpu.dot_dimension_numbers<[1], [0], [0], [1], [0, 0, 1, 1], [], []>} : vector<16x150xbf16>, vector<150x25xbf16>, vector<16x25xf32> -> vector<16x25xf32>
    %12 = arith.maximumf %8, %11 : vector<16x25xf32>
    %c0_15 = arith.constant 0 : index
    %c3 = arith.constant 3 : index
    %c0_16 = arith.constant 0 : index
    %c0_17 = arith.constant 0 : index
    %13 = vector.load %arg1[%c0_15, %c3, %c0_16, %c0_17] : memref<1x4x150x25xbf16, #tpu.memory_space<vmem>>, vector<1x1x150x25xbf16>
    %14 = vector.shape_cast %13 : vector<1x1x150x25xbf16> to vector<150x25xbf16>
    %cst_18 = arith.constant dense<0.000000e+00> : vector<16x25xf32>
    %15 = tpu.matmul %0, %14, %cst_18 {dimension_numbers = #tpu.dot_dimension_numbers<[1], [0], [0], [1], [0, 0, 1, 1], [], []>} : vector<16x150xbf16>, vector<150x25xbf16>, vector<16x25xf32> -> vector<16x25xf32>
    %16 = arith.maximumf %12, %15 : vector<16x25xf32>
    %17 = vector.broadcast %1 : vector<16x1xf32> to vector<16x25xf32>
    %18 = arith.addf %16, %17 : vector<16x25xf32>
    %cst_19 = arith.constant 0.000000e+00 : f32
    %19 = vector.broadcast %cst_19 : f32 to vector<16x25xf32>
    %20 = arith.maximumf %18, %19 : vector<16x25xf32>
    %21 = arith.truncf %20 : vector<16x25xf32> to vector<16x25xbf16>
    %c0_20 = arith.constant 0 : index
    %c0_21 = arith.constant 0 : index
    %c0_22 = arith.constant 0 : index
    %22 = vector.load %arg4[%c0_20, %c0_21, %c0_22] : memref<1x16x25xbf16, #tpu.memory_space<vmem>>, vector<1x16x25xbf16>
    %23 = vector.shape_cast %22 : vector<1x16x25xbf16> to vector<16x25xbf16>
    %24 = vector.shape_cast %21 : vector<16x25xbf16> to vector<1x16x25xbf16>
    tpu.vector_store %arg4[%c0_20, %c0_21, %c0_22], %24 {strides = array<i32>} : memref<1x16x25xbf16, #tpu.memory_space<vmem>>, vector<1x16x25xbf16>,
    return
  }
  func.func @transform_0(%arg0: i32) -> (i32, i32, i32, i32) {
    %c0_i32 = arith.constant 0 : i32
    %c0_i32_0 = arith.constant 0 : i32
    %c0_i32_1 = arith.constant 0 : i32
    %c0_i32_2 = arith.constant 0 : i32
    return %arg0, %c0_i32, %c0_i32_0, %c0_i32_1 : i32, i32, i32, i32
  }
  func.func @transform_1(%arg0: i32) -> (i32, i32) {
    %c0_i32 = arith.constant 0 : i32
    %c0_i32_0 = arith.constant 0 : i32
    %c0_i32_1 = arith.constant 0 : i32
    return %c0_i32, %c0_i32_0 : i32, i32
  }
  func.func @transform_2(%arg0: i32) -> (i32, i32) {
    %c0_i32 = arith.constant 0 : i32
    %c0_i32_0 = arith.constant 0 : i32
    %c0_i32_1 = arith.constant 0 : i32
    return %c0_i32, %c0_i32_0 : i32, i32
  }
  func.func @transform_3(%arg0: i32) -> (i32, i32, i32) {
    %c0_i32 = arith.constant 0 : i32
    %c0_i32_0 = arith.constant 0 : i32
    %c0_i32_1 = arith.constant 0 : i32
    return %arg0, %c0_i32, %c0_i32_0 : i32, i32, i32
  }
}

module attributes {stable_mosaic.version = 11 : i64} {
  func.func @_fc_fused_kernel(%arg0: i32, %arg1: memref<2x400xbf16, #tpu.memory_space<vmem>>, %arg2: memref<400x120xbf16, #tpu.memory_space<vmem>>, %arg3: memref<1x120xf32, #tpu.memory_space<vmem>>, %arg4: memref<120x84xbf16, #tpu.memory_space<vmem>>, %arg5: memref<1x84xf32, #tpu.memory_space<vmem>>, %arg6: memref<84x10xbf16, #tpu.memory_space<vmem>>, %arg7: memref<1x10xf32, #tpu.memory_space<vmem>>, %arg8: memref<2x10xf32, #tpu.memory_space<vmem>>) attributes {dimension_semantics = [#tpu.dimension_semantics<arbitrary>], iteration_bounds = array<i64: 1>, scalar_prefetch = 0 : i64, scratch_operands = 0 : i64, tpu.core_type = #tpu.core_type<tc>, window_params = [{pipeline_mode = #tpu.pipeline_mode<synchronous>, transform_indices = @transform_0, window_bounds = array<i64: 2, 400>}, {pipeline_mode = #tpu.pipeline_mode<synchronous>, transform_indices = @transform_1, window_bounds = array<i64: 400, 120>}, {pipeline_mode = #tpu.pipeline_mode<synchronous>, transform_indices = @transform_2, window_bounds = array<i64: 1, 120>}, {pipeline_mode = #tpu.pipeline_mode<synchronous>, transform_indices = @transform_3, window_bounds = array<i64: 120, 84>}, {pipeline_mode = #tpu.pipeline_mode<synchronous>, transform_indices = @transform_4, window_bounds = array<i64: 1, 84>}, {pipeline_mode = #tpu.pipeline_mode<synchronous>, transform_indices = @transform_5, window_bounds = array<i64: 84, 10>}, {pipeline_mode = #tpu.pipeline_mode<synchronous>, transform_indices = @transform_6, window_bounds = array<i64: 1, 10>}, {pipeline_mode = #tpu.pipeline_mode<synchronous>, transform_indices = @transform_7, window_bounds = array<i64: 2, 10>}]} {
    %c0 = arith.constant 0 : index
    %c0_0 = arith.constant 0 : index
    %0 = vector.load %arg1[%c0, %c0_0] : memref<2x400xbf16, #tpu.memory_space<vmem>>, vector<2x400xbf16>
    %c0_1 = arith.constant 0 : index
    %c0_2 = arith.constant 0 : index
    %1 = vector.load %arg2[%c0_1, %c0_2] : memref<400x120xbf16, #tpu.memory_space<vmem>>, vector<400x120xbf16>
    %cst = arith.constant dense<0.000000e+00> : vector<2x120xf32>
    %2 = tpu.matmul %0, %1, %cst {dimension_numbers = #tpu.dot_dimension_numbers<[1], [0], [0], [1], [0, 0, 1, 1], [], []>} : vector<2x400xbf16>, vector<400x120xbf16>, vector<2x120xf32> -> vector<2x120xf32>
    %c0_3 = arith.constant 0 : index
    %c0_4 = arith.constant 0 : index
    %3 = vector.load %arg3[%c0_3, %c0_4] : memref<1x120xf32, #tpu.memory_space<vmem>>, vector<1x120xf32>
    %4 = vector.broadcast %3 : vector<1x120xf32> to vector<2x120xf32>
    %5 = arith.addf %2, %4 : vector<2x120xf32>
    %cst_5 = arith.constant 0.000000e+00 : f32
    %6 = vector.broadcast %cst_5 : f32 to vector<2x120xf32>
    %7 = arith.maximumf %5, %6 : vector<2x120xf32>
    %8 = arith.truncf %7 : vector<2x120xf32> to vector<2x120xbf16>
    %c0_6 = arith.constant 0 : index
    %c0_7 = arith.constant 0 : index
    %9 = vector.load %arg4[%c0_6, %c0_7] : memref<120x84xbf16, #tpu.memory_space<vmem>>, vector<120x84xbf16>
    %cst_8 = arith.constant dense<0.000000e+00> : vector<2x84xf32>
    %10 = tpu.matmul %8, %9, %cst_8 {dimension_numbers = #tpu.dot_dimension_numbers<[1], [0], [0], [1], [0, 0, 1, 1], [], []>} : vector<2x120xbf16>, vector<120x84xbf16>, vector<2x84xf32> -> vector<2x84xf32>
    %c0_9 = arith.constant 0 : index
    %c0_10 = arith.constant 0 : index
    %11 = vector.load %arg5[%c0_9, %c0_10] : memref<1x84xf32, #tpu.memory_space<vmem>>, vector<1x84xf32>
    %12 = vector.broadcast %11 : vector<1x84xf32> to vector<2x84xf32>
    %13 = arith.addf %10, %12 : vector<2x84xf32>
    %cst_11 = arith.constant 0.000000e+00 : f32
    %14 = vector.broadcast %cst_11 : f32 to vector<2x84xf32>
    %15 = arith.maximumf %13, %14 : vector<2x84xf32>
    %16 = arith.truncf %15 : vector<2x84xf32> to vector<2x84xbf16>
    %c0_12 = arith.constant 0 : index
    %c0_13 = arith.constant 0 : index
    %17 = vector.load %arg6[%c0_12, %c0_13] : memref<84x10xbf16, #tpu.memory_space<vmem>>, vector<84x10xbf16>
    %cst_14 = arith.constant dense<0.000000e+00> : vector<2x10xf32>
    %18 = tpu.matmul %16, %17, %cst_14 {dimension_numbers = #tpu.dot_dimension_numbers<[1], [0], [0], [1], [0, 0, 1, 1], [], []>} : vector<2x84xbf16>, vector<84x10xbf16>, vector<2x10xf32> -> vector<2x10xf32>
    %c0_15 = arith.constant 0 : index
    %c0_16 = arith.constant 0 : index
    %19 = vector.load %arg7[%c0_15, %c0_16] : memref<1x10xf32, #tpu.memory_space<vmem>>, vector<1x10xf32>
    %20 = vector.broadcast %19 : vector<1x10xf32> to vector<2x10xf32>
    %21 = arith.addf %18, %20 : vector<2x10xf32>
    %cst_17 = arith.constant 0.000000e+00 : f32
    %22 = vector.broadcast %cst_17 : f32 to vector<2x10xf32>
    %23 = arith.maximumf %21, %22 : vector<2x10xf32>
    %c0_18 = arith.constant 0 : index
    %c0_19 = arith.constant 0 : index
    %24 = vector.load %arg8[%c0_18, %c0_19] : memref<2x10xf32, #tpu.memory_space<vmem>>, vector<2x10xf32>
    tpu.vector_store %arg8[%c0_18, %c0_19], %23 {strides = array<i32>} : memref<2x10xf32, #tpu.memory_space<vmem>>, vector<2x10xf32>,
    return
  }
  func.func @transform_0(%arg0: i32) -> (i32, i32) {
    %c0_i32 = arith.constant 0 : i32
    %c0_i32_0 = arith.constant 0 : i32
    %c0_i32_1 = arith.constant 0 : i32
    return %c0_i32, %c0_i32_0 : i32, i32
  }
  func.func @transform_1(%arg0: i32) -> (i32, i32) {
    %c0_i32 = arith.constant 0 : i32
    %c0_i32_0 = arith.constant 0 : i32
    %c0_i32_1 = arith.constant 0 : i32
    return %c0_i32, %c0_i32_0 : i32, i32
  }
  func.func @transform_2(%arg0: i32) -> (i32, i32) {
    %c0_i32 = arith.constant 0 : i32
    %c0_i32_0 = arith.constant 0 : i32
    %c0_i32_1 = arith.constant 0 : i32
    return %c0_i32, %c0_i32_0 : i32, i32
  }
  func.func @transform_3(%arg0: i32) -> (i32, i32) {
    %c0_i32 = arith.constant 0 : i32
    %c0_i32_0 = arith.constant 0 : i32
    %c0_i32_1 = arith.constant 0 : i32
    return %c0_i32, %c0_i32_0 : i32, i32
  }
  func.func @transform_4(%arg0: i32) -> (i32, i32) {
    %c0_i32 = arith.constant 0 : i32
    %c0_i32_0 = arith.constant 0 : i32
    %c0_i32_1 = arith.constant 0 : i32
    return %c0_i32, %c0_i32_0 : i32, i32
  }
  func.func @transform_5(%arg0: i32) -> (i32, i32) {
    %c0_i32 = arith.constant 0 : i32
    %c0_i32_0 = arith.constant 0 : i32
    %c0_i32_1 = arith.constant 0 : i32
    return %c0_i32, %c0_i32_0 : i32, i32
  }
  func.func @transform_6(%arg0: i32) -> (i32, i32) {
    %c0_i32 = arith.constant 0 : i32
    %c0_i32_0 = arith.constant 0 : i32
    %c0_i32_1 = arith.constant 0 : i32
    return %c0_i32, %c0_i32_0 : i32, i32
  }
  func.func @transform_7(%arg0: i32) -> (i32, i32) {
    %c0_i32 = arith.constant 0 : i32
    %c0_i32_0 = arith.constant 0 : i32
    %c0_i32_1 = arith.constant 0 : i32
    return %c0_i32, %c0_i32_0 : i32, i32
  }
}

</mosaic_0001>

<bundles_post_ra>
// kernel: pytorch_cnn_forward.3
= control target key start
LH: loop header
LB: loop body
LE: loop exit
PB: predicated region body
PF: predicated region fallthrough
CT: control target
= control target key end

     0   :  { %s876_s12 = smov 0   ;;  %s964_s0 = inlined_call_operand.vmem [shape: bf16[2,4,75,196], index: 0, kind: input, shape index: {}]   ;;  %s965_s1 = inlined_call_operand.vmem [shape: bf16[6,75], index: 1, kind: input, shape index: {}]   ;;  %s966_s2 = inlined_call_operand.vmem [shape: f32[6,1], index: 2, kind: input, shape index: {}]   ;;  %s967_s3 = inlined_call_operand.vmem [shape: bf16[2,6,196], index: 3, kind: output, shape index: {}]  }
   0x1 LB: > { %s687_s13 = sadd.s32 4294967295, %s852_s12   ;;  %p691_p0 = scmp.ge.s32.totalorder %s852_s12, 1  ;;  %s852_s12 = sphi %s876_s12, %s13_s12  }
   0x2   : > { %p137_p1 = scmp.lt.s32.totalorder %s852_s12, 3 }
   0x4   : > { %p138_p2 = pnand %p691_p0, %p137_p1 }
   0x5   : > { %p161_p3 = scmp.lt.s32.totalorder (!%p138_p2), %s687_s13, 1  ;;  %v854_v0 = vmov (!%p138_p2), 0   ;;  %v173_v1 = vld [vmem:[%s966_s2] sm:$0x3f] (!%p138_p2)  ;;  %vm236_vm0 = vcmask (!%p138_p2), 1044480   ;;  %vm237_vm1 = vcmask (!%p138_p2), 1045504  }
   0x6   : > { %141 = sbr.rel (%p138_p2) target bundleno = 282 (0x11a), region = 32  ;;  %278 = vmatprep.mubr.bf16.mxu0 (!%p138_p2), %v854_v0  ;;  %384 = vmatprep.mubr.bf16.mxu1 (!%p138_p2), %v854_v0  ;;  %v855_v11 = vmov (!%p138_p2), 65535   ;;  %v172_v31 = vld [vmem:[%s965_s1] sm:$0x7] (!%p138_p2)  ;;  %vm232_vm2 = vcmask (!%p138_p2), 613376   ;;  %vm628_vm3 = vcmask (!%p138_p2), 1042432  }
   0x7   : > { %785 = vset.pattern.permute.xlu0 (!%p138_p2), %v854_v0  ;;  %v238_v12 = vsel (!%p138_p2), %vm236_vm0, 4294967295, %v855_v11  ;;  %vm629_vm4 = vcmask (!%p138_p2), 555012  }
   0x8   : > { %613 = vperm.xlu0 (!%p138_p2), %785, %v173_v1   ;;  %v914_v20 = vsel (!%p138_p2), %vm237_vm1, %v238_v12, 0  ;;  %vm630_vm5 = vmor (!%p138_p2), %vm629_vm4, %vm628_vm3 }
   0xd   : > { %s969_s13 = smov (!%p161_p3, %s687_s13), 1 }
   0xe   : > { %s774_s16 = smul.u32 320, %s969_s13  ;;  %s772_s22 = sshll.u32 %s969_s13, 3 }
   0xf   : > { %s170_s25 = scalar_lea.vmem %s967_s3, %s772_s22 }
  0x10   : > { %s896_s19 = scalar_lea.vmem %s964_s0, %s774_s16 }
  0x11   : > { %v786_v2 = vld [vmem:[%s896_s19 + $0x4] ss:$8 sps:$4 sm:$0xff]   ;;  %v788_v3 = vld [vmem:[%s896_s19 + $0x54] ss:$8 sps:$4 sm:$0xff]   ;;  %v790_v4 = vld [vmem:[%s896_s19] ss:$8 sps:$4 sm:$0xff]  }
  0x12   : > { %246 = vmatprep.subr.bf16.mxu0 %v786_v2  ;;  %v791_v5 = vld [vmem:[%s896_s19 + $0x50] ss:$8 sps:$4 sm:$0xff]   ;;  %352 = vmatprep.subr.bf16.mxu1 %v788_v3  ;;  %v792_v6 = vld [vmem:[%s896_s19 + $0x14] ss:$8 sps:$4 sm:$0xff]   ;;  %v794_v7 = vld [vmem:[%s896_s19 + $0x64] ss:$8 sps:$4 sm:$0xff]  }
  0x13   : > { %247 = vmatpush1.bf16.msra.mxu0 %v790_v4  ;;  %353 = vmatpush1.bf16.msra.mxu1 %v791_v5  ;;  %v796_v8 = vld [vmem:[%s896_s19 + $0x10] ss:$8 sps:$4 sm:$0xff]   ;;  %v797_v9 = vld [vmem:[%s896_s19 + $0x60] ss:$8 sps:$4 sm:$0xff]   ;;  %v798_v10 = vld [vmem:[%s896_s19 + $0x24] ss:$8 sps:$4 sm:$0xff]  }
  0x14   : > { %248 = vmatprep.subr.bf16.mxu0 %v792_v6  ;;  %354 = vmatprep.subr.bf16.mxu1 %v794_v7  ;;  %v800_v13 = vld [vmem:[%s896_s19 + $0x74] ss:$8 sps:$4 sm:$0xff]   ;;  %v802_v14 = vld [vmem:[%s896_s19 + $0x20] ss:$8 sps:$4 sm:$0xff]   ;;  %v803_v15 = vld [vmem:[%s896_s19 + $0x70] ss:$8 sps:$4 sm:$0xff]  }
  0x15   : > { %v804_v16 = vld [vmem:[%s896_s19 + $0x34] ss:$8 sps:$4 sm:$0xff]   ;;  %v806_v17 = vld [vmem:[%s896_s19 + $0x84] ss:$8 sps:$4 sm:$0xff]   ;;  %v808_v18 = vld [vmem:[%s896_s19 + $0x30] ss:$8 sps:$4 sm:$0xff]  }
  0x16   : > { %v809_v19 = vld [vmem:[%s896_s19 + $0x80] ss:$8 sps:$4 sm:$0xff]   ;;  %v810_v21 = vld [vmem:[%s896_s19 + $0x44] ss:$8 sps:$4 sm:$0x3f]  }
  0x17   : > { %249 = vmatpush1.bf16.msra.mxu0 %v796_v8  ;;  %355 = vmatpush1.bf16.msra.mxu1 %v797_v9  ;;  %v812_v22 = vld [vmem:[%s896_s19 + $0x94] ss:$8 sps:$4 sm:$0x3f]   ;;  %v244_v23 = vand.u32 %v810_v21, %v914_v20  ;;  %v814_v24 = vld [vmem:[%s896_s19 + $0x40] ss:$8 sps:$4 sm:$0x3f]  }
  0x18   : > { %250 = vmatprep.subr.bf16.mxu0 %v798_v10  ;;  %356 = vmatprep.subr.bf16.mxu1 %v800_v13  ;;  %v815_v25 = vld [vmem:[%s896_s19 + $0x90] ss:$8 sps:$4 sm:$0x3f]   ;;  %v350_v26 = vand.u32 %v812_v22, %v914_v20  ;;  %v241_v27 = vand.u32 %v814_v24, %v914_v20  ;;  %v818_v29 = vld [vmem:[%s896_s19 + $0xa4] ss:$8 sps:$4 sm:$0xff]  }
  0x19   : > { %v347_v28 = vand.u32 %v815_v25, %v914_v20  ;;  %v821_v30 = vld [vmem:[%s896_s19 + $0xf4] ss:$8 sps:$4 sm:$0xff]   ;;  %v816_v32 = vld [vmem:[%s896_s19 + $0xa0] ss:$8 sps:$4 sm:$0xff]   ;;  %v819_v33 = vld [vmem:[%s896_s19 + $0xf0] ss:$8 sps:$4 sm:$0xff]  }
  0x1a   : > { %v824_v34 = vld [vmem:[%s896_s19 + $0xb4] ss:$8 sps:$4 sm:$0xff]   ;;  %v827_v35 = vld [vmem:[%s896_s19 + $0x104] ss:$8 sps:$4 sm:$0xff]   ;;  %v822_v36 = vld [vmem:[%s896_s19 + $0xb0] ss:$8 sps:$4 sm:$0xff]  }
  0x1b   : > { %251 = vmatpush1.bf16.msra.mxu0 %v802_v14  ;;  %357 = vmatpush1.bf16.msra.mxu1 %v803_v15  ;;  %v825_v37 = vld [vmem:[%s896_s19 + $0x100] ss:$8 sps:$4 sm:$0xff]   ;;  %v830_v38 = vld [vmem:[%s896_s19 + $0xc4] ss:$8 sps:$4 sm:$0xff]   ;;  %v833_v39 = vld [vmem:[%s896_s19 + $0x114] ss:$8 sps:$4 sm:$0xff]  }
  0x1c   : > { %252 = vmatprep.subr.bf16.mxu0 %v804_v16  ;;  %358 = vmatprep.subr.bf16.mxu1 %v806_v17  ;;  %v828_v40 = vld [vmem:[%s896_s19 + $0xc0] ss:$8 sps:$4 sm:$0xff]   ;;  %v831_v41 = vld [vmem:[%s896_s19 + $0x110] ss:$8 sps:$4 sm:$0xff]   ;;  %v836_v42 = vld [vmem:[%s896_s19 + $0xd4] ss:$8 sps:$4 sm:$0xff]  }
  0x1d   : > { %v839_v43 = vld [vmem:[%s896_s19 + $0x124] ss:$8 sps:$4 sm:$0xff]   ;;  %v845_v45 = vld [vmem:[%s896_s19 + $0x134] ss:$8 sps:$4 sm:$0x3f]  }
  0x1e   : > { %v842_v44 = vld [vmem:[%s896_s19 + $0xe4] ss:$8 sps:$4 sm:$0x3f]   ;;  %v834_v46 = vld [vmem:[%s896_s19 + $0xd0] ss:$8 sps:$4 sm:$0xff]   ;;  %v566_v51 = vand.u32 %v845_v45, %v914_v20 }
  0x1f   : > { %253 = vmatpush1.bf16.msra.mxu0 %v808_v18  ;;  %359 = vmatpush1.bf16.msra.mxu1 %v809_v19  ;;  %v837_v47 = vld [vmem:[%s896_s19 + $0x120] ss:$8 sps:$4 sm:$0xff]   ;;  %v843_v49 = vld [vmem:[%s896_s19 + $0x130] ss:$8 sps:$4 sm:$0x3f]   ;;  %v458_v50 = vand.u32 %v842_v44, %v914_v20 }
  0x20   : > { %254 = vmatprep.subr.bf16.mxu0 %v244_v23  ;;  %360 = vmatprep.subr.bf16.mxu1 %v350_v26  ;;  %v840_v48 = vld [vmem:[%s896_s19 + $0xe0] ss:$8 sps:$4 sm:$0x3f]   ;;  %v563_v53 = vand.u32 %v843_v49, %v914_v20 }
  0x21   : > { %v455_v52 = vand.u32 %v840_v48, %v914_v20 }
  0x23   : > { %255 = vmatpush1.bf16.msra.mxu0 %v241_v27  ;;  %361 = vmatpush1.bf16.msra.mxu1 %v347_v28 }
  0x24   : > { %460 = vmatprep.subr.bf16.mxu0 %v818_v29  ;;  %568 = vmatprep.subr.bf16.mxu1 %v821_v30 }
  0x26   : > { %705 = vmatmul.mubr.msk.bf16.vlgmr.msra.gmra.mrb[0].mxu0 %vm232_vm2, %v172_v31  ;;  %726 = vmatmul.mubr.msk.bf16.vlgmr.msra.gmra.mrb[0].mxu1 %vm232_vm2, %v172_v31 }
  0x27   : > { %461 = vmatpush1.bf16.msra.mxu0 %v816_v32  ;;  %569 = vmatpush1.bf16.msra.mxu1 %v819_v33 }
  0x28   : > { %462 = vmatprep.subr.bf16.mxu0 %v824_v34  ;;  %570 = vmatprep.subr.bf16.mxu1 %v827_v35 }
  0x29   : > { %492 = vmatprep.mubr.bf16.mxu0 %v854_v0  ;;  %600 = vmatprep.mubr.bf16.mxu1 %v854_v0 }
  0x2b   : > { %463 = vmatpush1.bf16.msra.mxu0 %v822_v36  ;;  %571 = vmatpush1.bf16.msra.mxu1 %v825_v37 }
  0x2c   : > { %464 = vmatprep.subr.bf16.mxu0 %v830_v38  ;;  %572 = vmatprep.subr.bf16.mxu1 %v833_v39 }
  0x2f   : > { %465 = vmatpush1.bf16.msra.mxu0 %v828_v40  ;;  %573 = vmatpush1.bf16.msra.mxu1 %v831_v41 }
  0x30   : > { %466 = vmatprep.subr.bf16.mxu0 %v836_v42  ;;  %574 = vmatprep.subr.bf16.mxu1 %v839_v43 }
  0x33   : > { %467 = vmatpush1.bf16.msra.mxu0 %v834_v46  ;;  %575 = vmatpush1.bf16.msra.mxu1 %v837_v47 }
  0x34   : > { %468 = vmatprep.subr.bf16.mxu0 %v458_v50  ;;  %576 = vmatprep.subr.bf16.mxu1 %v566_v51 }
  0x37   : > { %469 = vmatpush1.bf16.msra.mxu0 %v455_v52  ;;  %577 = vmatpush1.bf16.msra.mxu1 %v563_v53 }
  0x3a   : > { %747 = vmatmul.mubr.msk.bf16.vlgmr.msra.gmra.mrb[4].mxu0 %vm232_vm2, %v172_v31  ;;  %768 = vmatmul.mubr.msk.bf16.vlgmr.msra.gmra.mrb[4].mxu1 %vm232_vm2, %v172_v31 }
  0x87   : > { %v614_v0 = vpop.permute.xlu0 %613 }
  0xf9   : > { %v280_v54 = vpop.f32.mrb[0].mxu0  ;;  %v386_v55 = vpop.f32.mrb[0].mxu1 }
  0xfa   : > { %v393_v56 = vmax.f32 %v280_v54, %v386_v55  ;;  %v282_v57 = vpop.f32.mrb[1].mxu0  ;;  %v388_v58 = vpop.f32.mrb[1].mxu1 }
  0xfb   : > { %v394_v59 = vmax.f32 %v282_v57, %v388_v58  ;;  %v284_v60 = vpop.f32.mrb[2].mxu0  ;;  %v390_v61 = vpop.f32.mrb[2].mxu1 }
  0xfc   : > { %v285_v62 = vpop.f32.mrb[3].mxu0  ;;  %v391_v63 = vpop.f32.mrb[3].mxu1 }
 0x10d   : > { %v494_v1 = vpop.f32.mrb[4].mxu0  ;;  %v602_v2 = vpop.f32.mrb[4].mxu1 }
 0x10e   : > { %v501_v3 = vmax.f32 %v393_v56, %v494_v1  ;;  %v496_v4 = vpop.f32.mrb[5].mxu0  ;;  %v604_v5 = vpop.f32.mrb[5].mxu1 }
 0x10f   : > { %v502_v6 = vmax.f32 %v394_v59, %v496_v4  ;;  %v498_v7 = vpop.f32.mrb[6].mxu0  ;;  %v606_v8 = vpop.f32.mrb[6].mxu1 }
 0x110   : > { %v609_v9 = vmax.f32 %v501_v3, %v602_v2  ;;  %v499_v10 = vpop.f32.mrb[7].mxu0  ;;  %v607_v11 = vpop.f32.mrb[7].mxu1 }
 0x111   : > { %v610_v12 = vmax.f32 %v502_v6, %v604_v5 }
 0x112   : > { %v616_v13 = vadd.f32 %v614_v0, %v609_v9 }
 0x113   : > { %v617_v14 = vadd.f32 %v614_v0, %v610_v12 }
 0x114   : > { %v618_v15 = vmax.f32 %v616_v13, 0.0 }
 0x115   : > { %v619_v16 = vmax.f32 %v617_v14, 0.0 }
 0x117   : > { %v773_v17 = vpack.c.bf16 %v619_v16, %v618_v15 }
 0x119   : > { %631 = vst.msk [vmem:[%s170_s25] sm:$0x77] %vm630_vm5, %v773_v17 }
 0x11a PF: > { %s13_s12 = sadd.s32 1, %s852_s12  }
 0x11b   : > { %p10_p4 = scmp.ge.s32.totalorder %s13_s12, 4  }
 0x11d   :  { %12 = sbr.rel (!%p10_p4) target bundleno = 1 (0x1), region = 65 }

// kernel: pytorch_cnn_forward.4
= control target key start
LH: loop header
LB: loop body
LE: loop exit
PB: predicated region body
PF: predicated region fallthrough
CT: control target
= control target key end

     0   :  { %s960_s12 = smov 0   ;;  %s1096_s0 = inlined_call_operand.vmem [shape: bf16[2,4,150,25], index: 0, kind: input, shape index: {}]   ;;  %s1097_s1 = inlined_call_operand.vmem [shape: bf16[16,150], index: 1, kind: input, shape index: {}]   ;;  %s1098_s2 = inlined_call_operand.vmem [shape: f32[16,1], index: 2, kind: input, shape index: {}]   ;;  %s1099_s3 = inlined_call_operand.vmem [shape: bf16[2,16,25], index: 3, kind: output, shape index: {}]  }
   0x1 LB: > { %s759_s13 = sadd.s32 4294967295, %s937_s12   ;;  %p763_p0 = scmp.ge.s32.totalorder %s937_s12, 1  ;;  %s937_s12 = sphi %s960_s12, %s13_s12  }
   0x2   : > { %p137_p1 = scmp.lt.s32.totalorder %s937_s12, 3 }
   0x4   : > { %p138_p2 = pnand %p763_p0, %p137_p1 }
   0x5   : > { %p161_p3 = scmp.lt.s32.totalorder (!%p138_p2), %s759_s13, 1  ;;  %vm261_vm0 = vcmask (!%p138_p2), 179200   ;;  %v939_v0 = vmov (!%p138_p2), 0   ;;  %v973_v1 = vld [vmem:[%s1097_s1 + $0x4] ss:$8 sps:$4 sm:$0xff] (!%p138_p2)   ;;  %vm265_vm1 = vcmask (!%p138_p2), 1042432  }
   0x6   : > { %141 = sbr.rel (%p138_p2) target bundleno = 322 (0x142), region = 32  ;;  %269 = vmatprep.subr.bf16.mxu0 (!%p138_p2), %v939_v0  ;;  %390 = vmatprep.subr.bf16.mxu1 (!%p138_p2), %v939_v0  ;;  %v174_v2 = vld [vmem:[%s1098_s2] sm:$0xff] (!%p138_p2)  ;;  %v175_v3 = vld [vmem:[%s1098_s2 + $0x8] sm:$0xff] (!%p138_p2)  ;;  %vm701_vm2 = vcmask (!%p138_p2), 199680  }
   0x7   : > { %887 = vset.pattern.permute.xlu0 (!%p138_p2), %v939_v0  ;;  %779 = vmatprep.mubr.msk.bf16.mxu0 (!%p138_p2), %vm261_vm0, %v973_v1  ;;  %v1037_v26 = vld [vmem:[%s1097_s1] ss:$8 sps:$4 sm:$0xff] (!%p138_p2)  }
   0x8   : > { %809 = vmatprep.mubr.msk.bf16.mxu1 (!%p138_p2), %vm261_vm0, %v973_v1  ;;  %681 = vperm.xlu0 (!%p138_p2), %887, %v174_v2  }
   0xc   : > { %686 = vperm.xlu0 (!%p138_p2), %887, %v175_v3  }
   0xd   : > { %s1101_s13 = smov (!%p161_p3, %s759_s13), 1 }
   0xe   : > { %s877_s18 = smul.u32 304, %s1101_s13  ;;  %s874_s26 = sshll.u32 %s1101_s13, 3 }
   0xf   : > { %s170_s29 = scalar_lea.vmem %s1099_s3, %s874_s26 }
  0x10   : > { %s992_s23 = scalar_lea.vmem %s1096_s0, %s877_s18 }
  0x11   : > { %v888_v4 = vld [vmem:[%s992_s23] sm:$0xff]   ;;  %v889_v5 = vld [vmem:[%s992_s23 + $0x4c] sm:$0xff]   ;;  %v891_v7 = vld [vmem:[%s992_s23 + $0x54] sm:$0xff]  }
  0x12   : > { %270 = vmatpush1.bf16.msra.mxu0 %v888_v4  ;;  %v890_v6 = vld [vmem:[%s992_s23 + $0x8] sm:$0xff]   ;;  %391 = vmatpush1.bf16.msra.mxu1 %v889_v5  ;;  %v892_v8 = vld [vmem:[%s992_s23 + $0x10] sm:$0xff]   ;;  %v893_v9 = vld [vmem:[%s992_s23 + $0x5c] sm:$0xff]  }
  0x13   : > { %271 = vmatprep.subr.bf16.mxu0 %v939_v0  ;;  %392 = vmatprep.subr.bf16.mxu1 %v939_v0  ;;  %v894_v10 = vld [vmem:[%s992_s23 + $0x18] sm:$0xff]   ;;  %v895_v11 = vld [vmem:[%s992_s23 + $0x64] sm:$0xff]   ;;  %v897_v13 = vld [vmem:[%s992_s23 + $0x6c] sm:$0xff]  }
  0x14   : > { %v896_v12 = vld [vmem:[%s992_s23 + $0x20] sm:$0xff]   ;;  %v898_v14 = vld [vmem:[%s992_s23 + $0x28] sm:$0xff]   ;;  %v899_v15 = vld [vmem:[%s992_s23 + $0x74] sm:$0xff]  }
  0x15   : > { %v900_v16 = vld [vmem:[%s992_s23 + $0x30] sm:$0xff]   ;;  %v901_v17 = vld [vmem:[%s992_s23 + $0x7c] sm:$0xff]   ;;  %v903_v19 = vld [vmem:[%s992_s23 + $0x84] sm:$0xff]  }
  0x16   : > { %272 = vmatpush1.bf16.msra.mxu0 %v890_v6  ;;  %393 = vmatpush1.bf16.msra.mxu1 %v891_v7  ;;  %v902_v18 = vld [vmem:[%s992_s23 + $0x38] sm:$0xff]   ;;  %v906_v20 = vld [vmem:[%s992_s23 + $0x48] ss:$0 sps:$4 sm:$0x77]   ;;  %v904_v21 = vld [vmem:[%s992_s23 + $0x40] sm:$0xff]  }
  0x17   : > { %273 = vmatprep.subr.bf16.mxu0 %v939_v0  ;;  %394 = vmatprep.subr.bf16.mxu1 %v939_v0  ;;  %v907_v22 = vld [vmem:[%s992_s23 + $0x94] ss:$0 sps:$4 sm:$0x77]   ;;  %v905_v23 = vld [vmem:[%s992_s23 + $0x8c] sm:$0xff]   ;;  %v267_v24 = vsel %vm265_vm1, %v906_v20, 0  ;;  %v911_v27 = vld [vmem:[%s992_s23 + $0x98] sm:$0xff]  }
  0x18   : > { %v388_v25 = vsel %vm265_vm1, %v907_v22, 0  ;;  %v912_v28 = vld [vmem:[%s992_s23 + $0xe4] sm:$0xff]   ;;  %v914_v30 = vld [vmem:[%s992_s23 + $0xec] sm:$0xff]   ;;  %v916_v32 = vld [vmem:[%s992_s23 + $0xf4] sm:$0xff]  }
  0x19   : > { %v913_v29 = vld [vmem:[%s992_s23 + $0xa0] sm:$0xff]   ;;  %v915_v31 = vld [vmem:[%s992_s23 + $0xa8] sm:$0xff]   ;;  %v917_v33 = vld [vmem:[%s992_s23 + $0xb0] sm:$0xff]  }
  0x1a   : > { %274 = vmatpush1.bf16.msra.mxu0 %v892_v8  ;;  %395 = vmatpush1.bf16.msra.mxu1 %v893_v9  ;;  %v918_v34 = vld [vmem:[%s992_s23 + $0xfc] sm:$0xff]   ;;  %v920_v36 = vld [vmem:[%s992_s23 + $0x104] sm:$0xff]   ;;  %v922_v38 = vld [vmem:[%s992_s23 + $0x10c] sm:$0xff]  }
  0x1b   : > { %275 = vmatprep.subr.bf16.mxu0 %v939_v0  ;;  %396 = vmatprep.subr.bf16.mxu1 %v939_v0  ;;  %v919_v35 = vld [vmem:[%s992_s23 + $0xb8] sm:$0xff]   ;;  %v921_v37 = vld [vmem:[%s992_s23 + $0xc0] sm:$0xff]   ;;  %v923_v39 = vld [vmem:[%s992_s23 + $0xc8] sm:$0xff]  }
  0x1c   : > { %v924_v40 = vld [vmem:[%s992_s23 + $0x114] sm:$0xff]   ;;  %v926_v42 = vld [vmem:[%s992_s23 + $0x11c] sm:$0xff]   ;;  %v928_v44 = vld [vmem:[%s992_s23 + $0x124] sm:$0xff]  }
  0x1d   : > { %v925_v41 = vld [vmem:[%s992_s23 + $0xd0] sm:$0xff]   ;;  %v927_v43 = vld [vmem:[%s992_s23 + $0xd8] sm:$0xff]   ;;  %v929_v45 = vld [vmem:[%s992_s23 + $0xe0] ss:$0 sps:$4 sm:$0x77]  }
  0x1e   : > { %276 = vmatpush1.bf16.msra.mxu0 %v894_v10  ;;  %397 = vmatpush1.bf16.msra.mxu1 %v895_v11  ;;  %v930_v46 = vld [vmem:[%s992_s23 + $0x12c] ss:$0 sps:$4 sm:$0x77]   ;;  %v511_v47 = vsel %vm265_vm1, %v929_v45, 0 }
  0x1f   : > { %277 = vmatprep.subr.bf16.mxu0 %v939_v0  ;;  %398 = vmatprep.subr.bf16.mxu1 %v939_v0  ;;  %v634_v48 = vsel %vm265_vm1, %v930_v46, 0 }
  0x22   : > { %278 = vmatpush1.bf16.msra.mxu0 %v896_v12  ;;  %399 = vmatpush1.bf16.msra.mxu1 %v897_v13 }
  0x23   : > { %279 = vmatprep.subr.bf16.mxu0 %v939_v0  ;;  %400 = vmatprep.subr.bf16.mxu1 %v939_v0 }
  0x26   : > { %280 = vmatpush1.bf16.msra.mxu0 %v898_v14  ;;  %401 = vmatpush1.bf16.msra.mxu1 %v899_v15 }
  0x27   : > { %281 = vmatprep.subr.bf16.mxu0 %v939_v0  ;;  %402 = vmatprep.subr.bf16.mxu1 %v939_v0 }
  0x2a   : > { %282 = vmatpush1.bf16.msra.mxu0 %v900_v16  ;;  %403 = vmatpush1.bf16.msra.mxu1 %v901_v17 }
  0x2b   : > { %283 = vmatprep.subr.bf16.mxu0 %v939_v0  ;;  %404 = vmatprep.subr.bf16.mxu1 %v939_v0 }
  0x2e   : > { %284 = vmatpush1.bf16.msra.mxu0 %v902_v18  ;;  %405 = vmatpush1.bf16.msra.mxu1 %v903_v19 }
  0x2f   : > { %285 = vmatprep.subr.bf16.mxu0 %v939_v0  ;;  %406 = vmatprep.subr.bf16.mxu1 %v939_v0 }
  0x32   : > { %286 = vmatpush1.bf16.msra.mxu0 %v904_v21  ;;  %407 = vmatpush1.bf16.msra.mxu1 %v905_v23 }
  0x33   : > { %287 = vmatprep.subr.bf16.mxu0 %v939_v0  ;;  %408 = vmatprep.subr.bf16.mxu1 %v939_v0 }
  0x36   : > { %288 = vmatpush1.bf16.msra.mxu0 %v267_v24  ;;  %409 = vmatpush1.bf16.msra.mxu1 %v388_v25 }
  0x37   : > { %513 = vmatprep.subr.bf16.mxu0 %v939_v0  ;;  %636 = vmatprep.subr.bf16.mxu1 %v939_v0 }
  0x39   : > { %302 = vmatmul.mubr.bf16.vlgmr.msra.gmra.mrb[0].mxu0 %v1037_v26  ;;  %423 = vmatmul.mubr.bf16.vlgmr.msra.gmra.mrb[0].mxu1 %v1037_v26 }
  0x3a   : > { %514 = vmatpush1.bf16.msra.mxu0 %v911_v27  ;;  %637 = vmatpush1.bf16.msra.mxu1 %v912_v28 }
  0x3b   : > { %515 = vmatprep.subr.bf16.mxu0 %v939_v0  ;;  %638 = vmatprep.subr.bf16.mxu1 %v939_v0 }
  0x3c   : > { %839 = vmatprep.mubr.msk.bf16.mxu0 %vm261_vm0, %v973_v1  ;;  %869 = vmatprep.mubr.msk.bf16.mxu1 %vm261_vm0, %v973_v1 }
  0x3e   : > { %516 = vmatpush1.bf16.msra.mxu0 %v913_v29  ;;  %639 = vmatpush1.bf16.msra.mxu1 %v914_v30 }
  0x3f   : > { %517 = vmatprep.subr.bf16.mxu0 %v939_v0  ;;  %640 = vmatprep.subr.bf16.mxu1 %v939_v0 }
  0x42   : > { %518 = vmatpush1.bf16.msra.mxu0 %v915_v31  ;;  %641 = vmatpush1.bf16.msra.mxu1 %v916_v32 }
  0x43   : > { %519 = vmatprep.subr.bf16.mxu0 %v939_v0  ;;  %642 = vmatprep.subr.bf16.mxu1 %v939_v0 }
  0x46   : > { %520 = vmatpush1.bf16.msra.mxu0 %v917_v33  ;;  %643 = vmatpush1.bf16.msra.mxu1 %v918_v34 }
  0x47   : > { %521 = vmatprep.subr.bf16.mxu0 %v939_v0  ;;  %644 = vmatprep.subr.bf16.mxu1 %v939_v0 }
  0x4a   : > { %522 = vmatpush1.bf16.msra.mxu0 %v919_v35  ;;  %645 = vmatpush1.bf16.msra.mxu1 %v920_v36 }
  0x4b   : > { %523 = vmatprep.subr.bf16.mxu0 %v939_v0  ;;  %646 = vmatprep.subr.bf16.mxu1 %v939_v0 }
  0x4e   : > { %524 = vmatpush1.bf16.msra.mxu0 %v921_v37  ;;  %647 = vmatpush1.bf16.msra.mxu1 %v922_v38 }
  0x4f   : > { %525 = vmatprep.subr.bf16.mxu0 %v939_v0  ;;  %648 = vmatprep.subr.bf16.mxu1 %v939_v0 }
  0x52   : > { %526 = vmatpush1.bf16.msra.mxu0 %v923_v39  ;;  %649 = vmatpush1.bf16.msra.mxu1 %v924_v40 }
  0x53   : > { %527 = vmatprep.subr.bf16.mxu0 %v939_v0  ;;  %650 = vmatprep.subr.bf16.mxu1 %v939_v0 }
  0x56   : > { %528 = vmatpush1.bf16.msra.mxu0 %v925_v41  ;;  %651 = vmatpush1.bf16.msra.mxu1 %v926_v42 }
  0x57   : > { %529 = vmatprep.subr.bf16.mxu0 %v939_v0  ;;  %652 = vmatprep.subr.bf16.mxu1 %v939_v0 }
  0x5a   : > { %530 = vmatpush1.bf16.msra.mxu0 %v927_v43  ;;  %653 = vmatpush1.bf16.msra.mxu1 %v928_v44 }
  0x5b   : > { %531 = vmatprep.subr.bf16.mxu0 %v939_v0  ;;  %654 = vmatprep.subr.bf16.mxu1 %v939_v0 }
  0x5e   : > { %532 = vmatpush1.bf16.msra.mxu0 %v511_v47  ;;  %655 = vmatpush1.bf16.msra.mxu1 %v634_v48 }
  0x61   : > { %546 = vmatmul.mubr.bf16.vlgmr.msra.gmra.mrb[4].mxu0 %v1037_v26  ;;  %669 = vmatmul.mubr.bf16.vlgmr.msra.gmra.mrb[4].mxu1 %v1037_v26 }
  0x87   : > { %v682_v59 = vpop.permute.xlu0 %681 }
  0x8b   : > { %v687_v9 = vpop.permute.xlu0 %686 }
 0x10c   : > { %v303_v49 = vpop.f32.mrb[0].mxu0  ;;  %v424_v50 = vpop.f32.mrb[0].mxu1 }
 0x10d   : > { %v305_v51 = vpop.f32.mrb[1].mxu0  ;;  %v431_v52 = vmax.f32 %v303_v49, %v424_v50  ;;  %v426_v53 = vpop.f32.mrb[1].mxu1 }
 0x10e   : > { %v306_v54 = vpop.f32.mrb[2].mxu0  ;;  %v427_v55 = vpop.f32.mrb[2].mxu1 }
 0x10f   : > { %v308_v56 = vpop.f32.mrb[3].mxu0  ;;  %v432_v57 = vmax.f32 %v306_v54, %v427_v55  ;;  %v429_v58 = vpop.f32.mrb[3].mxu1 }
 0x134   : > { %v547_v60 = vpop.f32.mrb[4].mxu0  ;;  %v670_v62 = vpop.f32.mrb[4].mxu1 }
 0x135   : > { %v554_v61 = vmax.f32 %v431_v52, %v547_v60  ;;  %v549_v63 = vpop.f32.mrb[5].mxu0  ;;  %v672_v0 = vpop.f32.mrb[5].mxu1 }
 0x136   : > { %v550_v1 = vpop.f32.mrb[6].mxu0  ;;  %v673_v4 = vpop.f32.mrb[6].mxu1 }
 0x137   : > { %v677_v2 = vmax.f32 %v554_v61, %v670_v62  ;;  %v555_v3 = vmax.f32 %v432_v57, %v550_v1  ;;  %v552_v5 = vpop.f32.mrb[7].mxu0  ;;  %v675_v6 = vpop.f32.mrb[7].mxu1 }
 0x139   : > { %v689_v7 = vadd.f32 %v682_v59, %v677_v2  ;;  %v678_v8 = vmax.f32 %v555_v3, %v673_v4 }
 0x13b   : > { %v691_v10 = vmax.f32 %v689_v7, 0.0  ;;  %v690_v11 = vadd.f32 %v687_v9, %v678_v8 }
 0x13d   : > { %v875_v12 = vpack.c.bf16 %v691_v10, %v691_v10  ;;  %v692_v13 = vmax.f32 %v690_v11, 0.0 }
 0x13f   : > { %702 = vst.msk [vmem:[%s170_s29] sm:$0xf] %vm701_vm2, %v875_v12  ;;  %v876_v14 = vpack.c.bf16 %v692_v13, %v692_v13 }
 0x141   : > { %703 = vst.msk [vmem:[%s170_s29 + $0x4] sm:$0xf] %vm701_vm2, %v876_v14 }
 0x142 PF: > { %s13_s12 = sadd.s32 1, %s937_s12  }
 0x143   : > { %p10_p4 = scmp.ge.s32.totalorder %s13_s12, 4  }
 0x145   :  { %12 = sbr.rel (!%p10_p4) target bundleno = 1 (0x1), region = 65 }

// kernel: pytorch_cnn_forward.5
= control target key start
LH: loop header
LB: loop body
LE: loop exit
PB: predicated region body
PF: predicated region fallthrough
CT: control target
= control target key end

     0   :  { %v771_v1 = vmov 0   ;;  %v98_v20 = vlaneseq  ;;  %v772_v25 = vmov 1966171168   ;;  %vm264_vm0 = vcmask 130048   ;;  %s982_s0 = inlined_call_operand.vmem [shape: bf16[2,400], index: 0, kind: input, shape index: {}]   ;;  %s983_s1 = inlined_call_operand.vmem [shape: bf16[400,120], index: 1, kind: input, shape index: {}]   ;;  %s984_s2 = inlined_call_operand.vmem [shape: f32[1,120], index: 2, kind: input, shape index: {}]   ;;  %s985_s3 = inlined_call_operand.vmem [shape: bf16[120,84], index: 3, kind: input, shape index: {}]   ;;  %s986_s4 = inlined_call_operand.vmem [shape: f32[1,84], index: 4, kind: input, shape index: {}]   ;;  %s987_s5 = inlined_call_operand.vmem [shape: bf16[84,10], index: 5, kind: input, shape index: {}]   ;;  %s988_s6 = inlined_call_operand.vmem [shape: f32[1,10], index: 6, kind: input, shape index: {}]   ;;  %s989_s7 = inlined_call_operand.hbm [shape: f32[2,10], index: 7, kind: output, shape index: {}]  }
   0x1   :  { %v708_v0 = vld [vmem:[%s983_s1 + $0x40] sm:$0xff]   ;;  %308 = vmatprep.subr.bf16.mxu1 %v771_v1  ;;  %v711_v4 = vld [vmem:[%s983_s1 + $0x48] sm:$0xff]   ;;  %v714_v7 = vld [vmem:[%s983_s1 + $0x50] sm:$0xff]   ;;  %v96_v26 = vunpack.c.l.s4 %v772_v25  ;;  %v773_v38 = vmov 0.0  }
   0x2   :  { %v709_v2 = vld [vmem:[%s983_s1 + $0x80] sm:$0xff]   ;;  %629 = vmatprep.subr.bf16.mxu0 %v708_v0  ;;  %v712_v5 = vld [vmem:[%s983_s1 + $0x88] sm:$0xff]   ;;  %v715_v8 = vld [vmem:[%s983_s1 + $0x90] sm:$0xff]   ;;  %v99_v27 = vshrl.u32 %v98_v20, 7 }
   0x3   :  { %v710_v3 = vld [vmem:[%s983_s1] sm:$0xff]   ;;  %309 = vmatpush1.bf16.msra.mxu1 %v709_v2  ;;  %v713_v6 = vld [vmem:[%s983_s1 + $0x8] sm:$0xff]   ;;  %v716_v9 = vld [vmem:[%s983_s1 + $0x10] sm:$0xff]   ;;  %v97_v30 = vunpack.c.0.s8 %v96_v26 }
   0x4   :  { %630 = vmatpush3.bf16.msra.mxu0 %v710_v3  ;;  %310 = vmatprep.subr.bf16.mxu1 %v771_v1  ;;  %v717_v10 = vld [vmem:[%s983_s1 + $0x58] sm:$0xff]   ;;  %v720_v13 = vld [vmem:[%s983_s1 + $0x60] sm:$0xff]   ;;  %v723_v16 = vld [vmem:[%s983_s1 + $0x68] sm:$0xff]  }
   0x5   :  { %631 = vmatprep.subr.bf16.mxu0 %v711_v4  ;;  %v718_v11 = vld [vmem:[%s983_s1 + $0x98] sm:$0xff]   ;;  %v721_v14 = vld [vmem:[%s983_s1 + $0xa0] sm:$0xff]   ;;  %v724_v17 = vld [vmem:[%s983_s1 + $0xa8] sm:$0xff]   ;;  %v100_v32 = vsub.s32 %v97_v30, %v99_v27 }
   0x6   :  { %v719_v12 = vld [vmem:[%s983_s1 + $0x18] sm:$0xff]   ;;  %v722_v15 = vld [vmem:[%s983_s1 + $0x20] sm:$0xff]   ;;  %v725_v18 = vld [vmem:[%s983_s1 + $0x28] sm:$0xff]  }
   0x7   :  { %311 = vmatpush1.bf16.msra.mxu1 %v712_v5  ;;  %v726_v19 = vld [vmem:[%s983_s1 + $0x70] sm:$0xff]   ;;  %v584_v23 = vld.sshfl [vmem:[%s982_s0] sm:$0x33 pattern:$0x75316420]  ;;  %v729_v24 = vld [vmem:[%s983_s1 + $0x78] sm:$0xff]  }
   0x8   :  { %632 = vmatpush3.bf16.msra.mxu0 %v713_v6  ;;  %312 = vmatprep.subr.bf16.mxu1 %v771_v1  ;;  %v727_v21 = vld [vmem:[%s983_s1 + $0xb0] sm:$0xff]   ;;  %v730_v28 = vld [vmem:[%s983_s1 + $0xb8] sm:$0xff]   ;;  %v94_v29 = vcombine.high %v584_v23, %v584_v23  ;;  %v732_v33 = vld [vmem:[%s983_s1 + $0xc0] sm:$0xff]   ;;  %v101_v36 = vrot.slane %v584_v23, %v100_v32 }
   0x9   :  { %633 = vmatprep.subr.bf16.mxu0 %v714_v7  ;;  %v728_v22 = vld [vmem:[%s983_s1 + $0x30] sm:$0xff]   ;;  %v731_v31 = vld [vmem:[%s983_s1 + $0x38] sm:$0xff]   ;;  %v733_v34 = vld [vmem:[%s985_s3] sm:$0xff]  }
   0xa   :  { %v108_v35 = vrot.slane %v94_v29, %v100_v32  ;;  %v109_v39 = vcombine.high %v101_v36, %v101_v36  ;;  %v734_v40 = vld [vmem:[%s985_s3 + $0x8] sm:$0xff]  }
   0xb   :  { %313 = vmatpush1.bf16.msra.mxu1 %v715_v8 }
   0xc   :  { %634 = vmatpush3.bf16.msra.mxu0 %v716_v9  ;;  %314 = vmatprep.subr.bf16.mxu1 %v771_v1  ;;  %v110_v37 = vcombine.high %v108_v35, %v108_v35 }
   0xd   :  { %635 = vmatprep.subr.bf16.mxu0 %v717_v10  ;;  %300 = vmatprep.mubr.bf16.mxu0 %v108_v35 }
   0xe   :  { %610 = vmatprep.mubr.msk.bf16.mxu1 %vm264_vm0, %v110_v37 }
   0xf   :  { %315 = vmatpush1.bf16.msra.mxu1 %v718_v11 }
  0x10   :  { %636 = vmatpush3.bf16.msra.mxu0 %v719_v12  ;;  %316 = vmatprep.subr.bf16.mxu1 %v771_v1 }
  0x11   :  { %637 = vmatprep.subr.bf16.mxu0 %v720_v13 }
  0x13   :  { %317 = vmatpush1.bf16.msra.mxu1 %v721_v14 }
  0x14   :  { %638 = vmatpush3.bf16.msra.mxu0 %v722_v15  ;;  %318 = vmatprep.subr.bf16.mxu1 %v771_v1 }
  0x15   :  { %639 = vmatprep.subr.bf16.mxu0 %v723_v16 }
  0x17   :  { %319 = vmatpush1.bf16.msra.mxu1 %v724_v17 }
  0x18   :  { %640 = vmatpush3.bf16.msra.mxu0 %v725_v18  ;;  %320 = vmatprep.subr.bf16.mxu1 %v771_v1 }
  0x19   :  { %641 = vmatprep.subr.bf16.mxu0 %v726_v19 }
  0x1b   :  { %321 = vmatpush1.bf16.msra.mxu1 %v727_v21 }
  0x1c   :  { %642 = vmatpush3.bf16.msra.mxu0 %v728_v22  ;;  %322 = vmatprep.subr.bf16.mxu1 %v771_v1 }
  0x1d   :  { %643 = vmatprep.subr.bf16.mxu0 %v729_v24 }
  0x1f   :  { %323 = vmatpush1.bf16.msra.mxu1 %v730_v28 }
  0x20   :  { %644 = vmatpush3.bf16.msra.mxu0 %v731_v31  ;;  %324 = vmatprep.subr.bf16.mxu1 %v771_v1 }
  0x21   :  { %667 = vmatprep.subr.bf16.mxu0 %v773_v38 }
  0x23   :  { %301 = vmatmul.mubr.bf16.vlgmr.msra.gmra.mrb[0].mxu0 %v101_v36  ;;  %325 = vmatpush1.bf16.msra.mxu1 %v732_v33 }
  0x24   :  { %668 = vmatpush3.bf16.msra.mxu0 %v733_v34 }
  0x25   :  { %12 = vsyncpa [#allocation3], 0  ;;  %669 = vmatprep.subr.bf16.mxu0 %v773_v38  ;;  %687 = vmatprep.subr.bf16.mxu1 %v773_v38  ;;  %v735_v41 = vld [vmem:[%s985_s3 + $0x10] sm:$0xff]   ;;  %v736_v42 = vld [vmem:[%s985_s3 + $0x18] sm:$0xff]   ;;  %vm421_vm1 = vcmask 1043456   ;;  %vm774_vm2 = vmmov 0  }
  0x26   :  { %341 = vmatmul.mubr.bf16.vlgmr.msra.gmra.mrb[0].mxu1 %v109_v39  ;;  %v737_v43 = vld [vmem:[%s985_s3 + $0x20] sm:$0xff]   ;;  %v738_v44 = vld [vmem:[%s985_s3 + $0x28] sm:$0xff]   ;;  %v739_v45 = vld [vmem:[%s985_s3 + $0x30] sm:$0xff]   ;;  %683 = vmatprep.mubr.msk.bf16.mxu0 %vm774_vm2, %v773_v38  ;;  %vm417_vm3 = vcmask 982016   ;;  %vm522_vm4 = vcmask 1041408   ;;  %vm518_vm5 = vcmask 687104  }
  0x27   :  { %v740_v46 = vld [vmem:[%s985_s3 + $0x38] ss:$0 sps:$4 sm:$0xff]   ;;  %699 = vmatprep.mubr.msk.bf16.mxu1 %vm774_vm2, %v773_v38  ;;  %v741_v48 = vld [vmem:[%s987_s5] sm:$0xff]   ;;  %v742_v49 = vld [vmem:[%s987_s5 + $0x8] sm:$0xff]   ;;  %vm567_vm6 = vcmask 74752  }
  0x28   :  { %670 = vmatpush3.bf16.msra.mxu0 %v734_v40  ;;  %v423_v47 = vsel %vm421_vm1, %v740_v46, 0  ;;  %688 = vmatpush3.bf16.msra.mxu1 %v741_v48  ;;  %v743_v50 = vld [vmem:[%s987_s5 + $0x10] sm:$0xff]   ;;  %v744_v51 = vld [vmem:[%s987_s5 + $0x18] sm:$0xff]   ;;  %v583_v54 = vld [vmem:[%s984_s2] ss:$0 sm:$0xff] }
  0x29   :  { %671 = vmatprep.subr.bf16.mxu0 %v773_v38  ;;  %689 = vmatprep.subr.bf16.mxu1 %v773_v38  ;;  %v745_v2 = vld [vmem:[%s987_s5 + $0x20] sm:$0xff]   ;;  %v746_v3 = vld [vmem:[%s987_s5 + $0x28] ss:$0 sps:$4 sm:$0x33]   ;;  %s775_s5 = smov [#allocation2]  }
  0x2a   :  { %v524_v4 = vsel %vm522_vm4, %v746_v3, 0  ;;  %v611_v5 = vld [vmem:[%s986_s4] ss:$0 sm:$0xff]  ;;  %s575_s12 = sshll.u32 %s775_s5, 4  ;;  %s576_s12 = int_to_ptr.vmem [resolvable:$true] %s575_s12 }
  0x2b   :  { %v621_v13 = vld [vmem:[%s988_s6] ss:$0 sm:$0xff]  ;;  %s747_s4 = scalar_lea.vmem %s576_s12, 32  ;;  %p752_p1 = scmp.lt.s32.totalorder %s576_s12, %s576_s12 }
  0x2c   :  { %672 = vmatpush3.bf16.msra.mxu0 %v735_v41  ;;  %690 = vmatpush3.bf16.msra.mxu1 %v742_v49  ;;  %p748_p0 = scmp.ne.s32.totalorder %s576_s12, %s747_s4  ;;  %p753_p2 = scmp.lt.s32.totalorder %s747_s4, %s747_s4 }
  0x2d   :  { %673 = vmatprep.subr.bf16.mxu0 %v773_v38  ;;  %691 = vmatprep.subr.bf16.mxu1 %v773_v38 }
  0x2e   :  { %p754_p3 = por %p753_p2, %p752_p1 }
  0x30   :  { %674 = vmatpush3.bf16.msra.mxu0 %v736_v42  ;;  %692 = vmatpush3.bf16.msra.mxu1 %v743_v50  ;;  %p755_p4 = pnand %p754_p3, %p748_p0 }
  0x31   :  { %675 = vmatprep.subr.bf16.mxu0 %v773_v38  ;;  %693 = vmatprep.subr.bf16.mxu1 %v773_v38 }
  0x34   :  { %676 = vmatpush3.bf16.msra.mxu0 %v737_v43  ;;  %694 = vmatpush3.bf16.msra.mxu1 %v744_v51 }
  0x35   :  { %677 = vmatprep.subr.bf16.mxu0 %v773_v38  ;;  %695 = vmatprep.subr.bf16.mxu1 %v773_v38 }
  0x38   :  { %678 = vmatpush3.bf16.msra.mxu0 %v738_v44  ;;  %696 = vmatpush3.bf16.msra.mxu1 %v745_v2 }
  0x39   :  { %679 = vmatprep.subr.bf16.mxu0 %v773_v38  ;;  %697 = vmatprep.subr.bf16.mxu1 %v773_v38 }
  0x3c   :  { %680 = vmatpush3.bf16.msra.mxu0 %v739_v45  ;;  %698 = vmatpush3.bf16.msra.mxu1 %v524_v4 }
  0x3d   :  { %681 = vmatprep.subr.bf16.mxu0 %v773_v38 }
  0x40   :  { %682 = vmatpush3.bf16.msra.mxu0 %v423_v47 }
  0xf6   :  { %v645_v52 = vpop.f32.mrb[0].mxu0 }
  0xf7   :  { %v646_v53 = vpop.f32.mrb[1].mxu0 }
  0xf8   :  { %v647_v55 = vadd.f32 %v646_v53, %v645_v52  ;;  %v648_v56 = vpop.f32.mrb[2].mxu0 }
  0xf9   :  { %v649_v57 = vpop.f32.mrb[3].mxu0  ;;  %v342_v58 = vpop.f32.mrb[0].mxu1 }
  0xfa   :  { %v303_v59 = vadd.f32 %v647_v55, %v583_v54  ;;  %v344_v60 = vpop.f32.mrb[1].mxu1 }
  0xfb   :  { %v345_v61 = vpop.f32.mrb[2].mxu1 }
  0xfc   :  { %v343_v62 = vadd.f32 %v342_v58, %v303_v59  ;;  %v346_v63 = vpop.f32.mrb[3].mxu1 }
  0xfe   :  { %v348_v0 = vmax.f32 %v343_v62, 0.0 }
 0x100   :  { %v349_v1 = vpack.c.bf16 %v348_v0, %v348_v0 }
 0x102   :  { %684 = vmatmul.mubr.msk.bf16.vlgmr.msra.gmra.mrb[4].mxu0 %vm417_vm3, %v349_v1 }
 0x1d5   :  { %v459_v6 = vpop.f32.mrb[4].mxu0 }
 0x1d6   :  { %v460_v7 = vadd.f32 %v611_v5, %v459_v6  ;;  %v685_v8 = vpop.f32.mrb[5].mxu0 }
 0x1d7   :  { %v462_v9 = vpop.f32.mrb[6].mxu0 }
 0x1d8   :  { %v465_v10 = vmax.f32 %v460_v7, 0.0  ;;  %v686_v11 = vpop.f32.mrb[7].mxu0 }
 0x1da   :  { %v466_v12 = vpack.c.bf16 %v465_v10, %v465_v10 }
 0x1dc   :  { %700 = vmatmul.mubr.msk.bf16.vlgmr.msra.gmra.mrb[4].mxu1 %vm518_vm5, %v466_v12 }
 0x2af   :  { %v560_v14 = vpop.f32.mrb[4].mxu1 }
 0x2b0   :  { %v561_v15 = vadd.f32 %v621_v13, %v560_v14  ;;  %v701_v16 = vpop.f32.mrb[5].mxu1 }
 0x2b1   :  { %v563_v17 = vpop.f32.mrb[6].mxu1 }
 0x2b2   :  { %v566_v18 = vmax.f32 %v561_v15, 0.0  ;;  %v702_v19 = vpop.f32.mrb[7].mxu1 }
 0x2b4   :  { %568 = vst.msk [vmem:[#allocation2] sm:$0x3] %vm567_vm6, %v566_v18 }
 0x2b5   :  { %758 = shalt.err (!%p755_p4)
}
 0x2b6   :  { %s759_s14 = scalar_lea.hbm %s989_s7, 32 }
 0x2b7   :  { %p760_p5 = scmp.ne.s32.totalorder %s989_s7, %s759_s14  ;;  %p763_p6 = scmp.lt.u32.totalorder %s759_s14, %s989_s7 }
 0x2b9   :  { %p765_p7 = pnand %p763_p6, %p760_p5 }
 0x2bb   :  { %768 = shalt.err (!%p765_p7)
}
 0x2bc   :  { %578 = dma.vmem_to_hbm [thread:$0]  %s576_s12, 32, %s989_s7, [#allocation3]  }
 0x2bd   :  { %769 = dma.done.wait [#allocation3], 32  }
 0x2be   :  { %770 = vsyncadd [#allocation3], 4294967264 }
 0x2bf   :  { %582 = vsyncpa [#allocation3], 1 }

</bundles_post_ra>
